<compile_context>
chip_gen: v5e
topology: v5e:2x2
jax: 0.10.0
libtpu: 0.0.40
codegen_flags: <defaults>
</compile_context>

<pallas_src>
import math

import numpy as np
import jax
import jax.numpy as jnp
from jax import lax
from jax.experimental import pallas as pl
from jax.experimental.pallas import tpu as pltpu


_X1_SHAPE = (1, 5, 19, 39)

# name, cout, cin, kh, kw, stride, padding   (verbatim from the PyTorch spec)
_CONV_CFG = [
    ("conv2d0_1", 2, 5, 3, 5, (3, 5), (2, 1)),
    ("conv2d1_1", 5, 2, 3, 5, (5, 4), (1, 0)),
    ("conv2d0_2", 2, 3, 3, 4, (1, 4), (0, 1)),
    ("conv2d1_2", 4, 2, 1, 5, (1, 4), (1, 2)),
    ("conv2d2",   4, 4, 7, 7, (8, 8), (1, 1)),
    ("conv2d3",   5, 4, 9, 9, (2, 2), (2, 2)),
]

# Conv-input shape actually fed to each conv.  Where the original graph is
# inconsistent, the deterministic adapt() rule defines the shape (matching the
# previously validated implementation).
_CONV_IN_SHAPES = [
    (1, 5, 19, 39),   # conv2d0_1(x1)
    (5, 2, 6, 7),     # TODO(synk): reshape(5,2,6,7) invalid (112 != 420 elems) -> adapt()
    (1, 3, 7, 8),     # TODO(synk): reshape(v1_shape) invalid (50 != 112) and conv2d0_2 expects 3 in-chans -> adapt()
    (3, 2, 7, 11),    # TODO(synk): reshape(3,2,7,11) invalid (20 != 462 elems) -> adapt()
    (1, 4, 40, 40),   # TODO(synk): reshape(v2_shape) invalid (324 != 20) and conv2d2 needs 4 chans / >=7x7 spatial -> adapt()
    (1, 4, 5, 5),     # conv2d3(v3) (consistent)
]

# Flat sizes the activation is pushed through (in order) before each conv.
# Composing the adapt() steps == keep the first min(...) elements, zero-fill
# the rest.  Empty chain == previous tensor used directly.
_ADAPT_CHAINS = [
    [],            # x1 used directly
    [420],         # v1.reshape(5, 2, 6, 7)
    [112, 168],    # v1.reshape(v1_shape) then channel fix -> (1, 3, 7, 8)
    [462],         # v2.reshape(3, 2, 7, 11)
    [20, 6400],    # v2.reshape(v2_shape) then shape fix -> (1, 4, 40, 40)
    [],            # v3 used directly
]


def _conv_out_shape(in_shape, cfg):
    _, cout, cin, kh, kw, (sh, sw), (ph, pw) = cfg
    n, c, h, w = in_shape
    assert c == cin, (c, cin)
    ho = (h + 2 * ph - kh) // sh + 1
    wo = (w + 2 * pw - kw) // sw + 1
    assert ho > 0 and wo > 0
    return (n, cout, ho, wo)


# Static per-layer plan: flat source length, #elements kept by the adapt chain,
# conv output shape.
_SRC_LENS, _KEEP_LENS, _CONV_OUT_SHAPES = [], [], []
_shape = _X1_SHAPE
for _cfg, _in_shape, _chain in zip(_CONV_CFG, _CONV_IN_SHAPES, _ADAPT_CHAINS):
    _src_len = int(np.prod(_shape))
    assert (_chain[-1] if _chain else _src_len) == int(np.prod(_in_shape))
    _SRC_LENS.append(_src_len)
    _KEEP_LENS.append(min([_src_len] + _chain))
    _shape = _conv_out_shape(_in_shape, _cfg)
    _CONV_OUT_SHAPES.append(_shape)

_FINAL_SHAPE = _CONV_OUT_SHAPES[-1]        # (1, 5, 1, 1)
_OUT_LEN = int(np.prod(_FINAL_SHAPE))      # 5
_L_IN = _SRC_LENS[0]                       # 3705


# ---------------------------------------------------------------------------
# Parameter init (deterministic, PyTorch-like uniform bounds).
# ---------------------------------------------------------------------------
def init_conv(key, cout, cin, kh, kw):
    wkey, bkey = jax.random.split(key)
    fan_in = cin * kh * kw
    bound = 1.0 / math.sqrt(fan_in)
    w = jax.random.uniform(wkey, (cout, cin, kh, kw), jnp.float32, -bound, bound)
    b = jax.random.uniform(bkey, (cout,), jnp.float32, -bound, bound)
    return w, b


def init_params(key):
    keys = jax.random.split(key, len(_CONV_CFG))
    return [init_conv(k, cfg[1], cfg[2], cfg[3], cfg[4])
            for k, cfg in zip(keys, _CONV_CFG)]


# ---------------------------------------------------------------------------
# Init-time packing: build each conv's dense operator with NumPy index math,
# then compose all six affine layers into ONE (3705, 5) operator + folded bias.
# ---------------------------------------------------------------------------
def _conv_matrix(w, in_shape, stride, padding):
    """Dense (L_in, L_out) matrix of a 2D conv on NCHW-flattened vectors."""
    n, c, h, win = in_shape
    cout, cin, kh, kw = w.shape
    assert c == cin, (c, cin)
    sh, sw = stride
    ph, pw = padding
    ho = (h + 2 * ph - kh) // sh + 1
    wo = (win + 2 * pw - kw) // sw + 1
    l_in = n * c * h * win
    l_out = n * cout * ho * wo
    mat = np.zeros((l_in, l_out), dtype=np.float64)
    for bn in range(n):
        for oc in range(cout):
            for oh in range(ho):
                for ow in range(wo):
                    out_idx = ((bn * cout + oc) * ho + oh) * wo + ow
                    for ic in range(cin):
                        for ki in range(kh):
                            ih = oh * sh - ph + ki
                            if ih < 0 or ih >= h:
                                continue
                            for kj in range(kw):
                                iw = ow * sw - pw + kj
                                if iw < 0 or iw >= win:
                                    continue
                                in_idx = ((bn * c + ic) * h + ih) * win + iw
                                mat[in_idx, out_idx] += w[oc, ic, ki, kj]
    return mat, (n, cout, ho, wo)


def pack_params(raw_params):
    """Compose all six (adapt ∘ conv) affine maps into one operator + bias.

    Returns a single lane-dense f32 buffer of shape (5, 3706):
      columns 0..3704 : M_total^T   (out = x_flat @ M_total + b_total)
      column  3705    : folded bias b_total
    """
    m_total = None
    b_total = None
    for i, (cfg, (w, b)) in enumerate(zip(_CONV_CFG, raw_params)):
        _, cout, cin, kh, kw, stride, padding = cfg
        c_mat, out_shape = _conv_matrix(
            np.asarray(w, dtype=np.float64), _CONV_IN_SHAPES[i], stride, padding)
        assert out_shape == _CONV_OUT_SHAPES[i], (out_shape, _CONV_OUT_SHAPES[i])
        n_out, co, ho, wo = out_shape
        b_flat = np.tile(np.repeat(np.asarray(b, dtype=np.float64), ho * wo), n_out)
        keep = _KEEP_LENS[i]
        # adapt(): keep first `keep` source elems, zero-fill the rest -> only the
        # first `keep` rows of the conv matrix ever contribute.
        a_mat = c_mat[:keep, :]
        if m_total is None:
            assert keep == _SRC_LENS[i]
            m_total = a_mat
            b_total = b_flat
        else:
            m_total = m_total[:, :keep] @ a_mat
            b_total = b_total[:keep] @ a_mat + b_flat

    assert m_total.shape == (_L_IN, _OUT_LEN), m_total.shape
    packed = np.zeros((_OUT_LEN, _L_IN + 1), dtype=np.float32)
    packed[:, :_L_IN] = m_total.T
    packed[:, _L_IN] = b_total
    return jnp.asarray(packed)


# ---------------------------------------------------------------------------
# The single fused Pallas kernel: one VPU matvec (mul + lane reduce) + bias.
# ---------------------------------------------------------------------------
def _fused_forward_kernel(x_ref, wb_ref, o_ref):
    x = x_ref[...]                                   # (1, 3705)
    w = wb_ref[:, pl.ds(0, _L_IN)]                   # (5, 3705)  = M_total^T
    bias = wb_ref[:, pl.ds(_L_IN, 1)]                # (5, 1)
    # out[j] = sum_i x[i] * M[i, j] + b[j]; exact f32 on the VPU/XLU.
    o_ref[...] = jnp.sum(x * w, axis=-1, keepdims=True) + bias


@jax.jit
def forward(packed_wb, x1):
    x_flat = x1.reshape(1, _L_IN).astype(jnp.float32)
    out = pl.pallas_call(
        _fused_forward_kernel,
        out_shape=jax.ShapeDtypeStruct((_OUT_LEN, 1), jnp.float32),
        in_specs=[pl.BlockSpec(memory_space=pltpu.MemorySpace.VMEM),
                  pl.BlockSpec(memory_space=pltpu.MemorySpace.VMEM)],
        out_specs=pl.BlockSpec(memory_space=pltpu.MemorySpace.VMEM),
    )(x_flat, packed_wb)
    return out.reshape(_FINAL_SHAPE)


# ---------------------------------------------------------------------------
# Pure lax.conv reference with identical adapt() semantics (sanity check only).
# ---------------------------------------------------------------------------
def _layer_fn(src, *, w, b, in_shape, stride, padding, keep):
    n = int(np.prod(in_shape))
    s = src[:keep]                                   # adapt: truncation
    if keep < n:                                     # adapt: zero-fill
        s = jnp.concatenate([s, jnp.zeros((n - keep,), src.dtype)])
    x = s.reshape(in_shape)
    y = lax.conv_general_dilated(
        x.astype(jnp.float32), w,
        window_strides=stride,
        padding=[(padding[0], padding[0]), (padding[1], padding[1])],
        dimension_numbers=("NCHW", "OIHW", "NCHW"),
        precision=lax.Precision.HIGHEST,
    )
    y = y + b.reshape(1, -1, 1, 1)
    return y.reshape(-1)                             # flat NCHW output


def reference_forward(raw_params, x1):
    a = x1.reshape(-1).astype(jnp.float32)
    for i, (cfg, (w, b)) in enumerate(zip(_CONV_CFG, raw_params)):
        _, cout, cin, kh, kw, stride, padding = cfg
        a = _layer_fn(a, w=w, b=b, in_shape=_CONV_IN_SHAPES[i],
                      stride=stride, padding=padding, keep=_KEEP_LENS[i])
    return a.reshape(_FINAL_SHAPE)


if __name__ == "__main__":
    key = jax.random.PRNGKey(0)
    pkey, xkey = jax.random.split(key)
    raw_params = init_params(pkey)
    packed_wb = pack_params(raw_params)              # one-time init packing
    x1 = jax.random.normal(xkey, _X1_SHAPE, dtype=jnp.float32)

    out = jax.block_until_ready(forward(packed_wb, x1))
    assert out.shape == _FINAL_SHAPE, out.shape
    assert out.dtype == jnp.float32

    ref = jax.block_until_ready(reference_forward(raw_params, x1))
    assert np.allclose(np.asarray(out), np.asarray(ref), rtol=1e-3, atol=1e-4), (
        np.asarray(out), np.asarray(ref))

    print("KERNEL_OK")
</pallas_src>

<mosaic_0001>
module attributes {stable_mosaic.version = 11 : i64} {
  func.func @_fused_forward_kernel(%arg0: memref<1x3705xf32, #tpu.memory_space<vmem>>, %arg1: memref<5x3706xf32, #tpu.memory_space<vmem>>, %arg2: memref<5x1xf32, #tpu.memory_space<vmem>>) attributes {dimension_semantics = [], scalar_prefetch = 0 : i64, scratch_operands = 0 : i64, tpu.core_type = #tpu.core_type<tc>} {
    %c0 = arith.constant 0 : index
    %c0_0 = arith.constant 0 : index
    %0 = vector.load %arg0[%c0, %c0_0] : memref<1x3705xf32, #tpu.memory_space<vmem>>, vector<1x3705xf32>
    %c0_1 = arith.constant 0 : index
    %c0_2 = arith.constant 0 : index
    %1 = vector.load %arg1[%c0_1, %c0_2] : memref<5x3706xf32, #tpu.memory_space<vmem>>, vector<5x3705xf32>
    %c0_3 = arith.constant 0 : index
    %c3705 = arith.constant 3705 : index
    %2 = vector.load %arg1[%c0_3, %c3705] : memref<5x3706xf32, #tpu.memory_space<vmem>>, vector<5x1xf32>
    %3 = vector.broadcast %0 : vector<1x3705xf32> to vector<5x3705xf32>
    %4 = arith.mulf %3, %1 : vector<5x3705xf32>
    %cst = arith.constant dense<0.000000e+00> : vector<5xf32>
    %5 = vector.multi_reduction <add>, %4, %cst [1] : vector<5x3705xf32> to vector<5xf32>
    %6 = vector.shape_cast %5 : vector<5xf32> to vector<5x1xf32>
    %7 = arith.addf %6, %2 : vector<5x1xf32>
    %c0_4 = arith.constant 0 : index
    %c0_5 = arith.constant 0 : index
    %8 = vector.load %arg2[%c0_4, %c0_5] : memref<5x1xf32, #tpu.memory_space<vmem>>, vector<5x1xf32>
    tpu.vector_store %arg2[%c0_4, %c0_5], %7 {strides = array<i32>} : memref<5x1xf32, #tpu.memory_space<vmem>>, vector<5x1xf32>,
    return
  }
}

</mosaic_0001>

<bundles_post_ra>
// kernel: forward.1
= control target key start
LH: loop header
LB: loop body
LE: loop exit
PB: predicated region body
PF: predicated region fallthrough
CT: control target
= control target key end

     0   :  { %vm135_vm0 = vcmask 1044480   ;;  %vm191_vm1 = vcmask 987136   ;;  %vm201_vm2 = vcmask 4096   ;;  %s354_s0 = inlined_call_operand.vmem [shape: f32[1,3705], index: 0, kind: input, shape index: {}]   ;;  %s355_s1 = inlined_call_operand.vmem [shape: f32[5,3706], index: 1, kind: input, shape index: {}]   ;;  %s356_s2 = inlined_call_operand.vmem [shape: f32[5,1], index: 2, kind: output, shape index: {}]  }
   0x1   :  { %v11_v0 = vld [vmem:[%s354_s0] sm:$0xff]  ;;  %v16_v4 = vld [vmem:[%s355_s1 + $0x8] sm:$0x1f]  ;;  %v17_v6 = vld [vmem:[%s355_s1 + $0x10] sm:$0x1f] }
   0x2   :  { %v48_v1 = vperm.slane %v11_v0, 0  ;;  %v49_v2 = vperm.slane %v11_v0, 1  ;;  %v15_v3 = vld [vmem:[%s355_s1] sm:$0x1f]  ;;  %v50_v5 = vperm.slane %v11_v0, 2  ;;  %v51_v7 = vperm.slane %v11_v0, 3 }
   0x3   :  { %v18_v8 = vld [vmem:[%s355_s1 + $0x18] sm:$0x1f]  ;;  %v52_v9 = vperm.slane %v11_v0, 4  ;;  %v19_v12 = vld [vmem:[%s355_s1 + $0x20] sm:$0x1f]  ;;  %v53_v14 = vperm.slane %v11_v0, 5 }
   0x4   :  { %v106_v10 = vmul.f32 %v48_v1, %v15_v3  ;;  %v107_v11 = vmul.f32 %v49_v2, %v16_v4  ;;  %v108_v13 = vmul.f32 %v50_v5, %v17_v6  ;;  %v109_v15 = vmul.f32 %v51_v7, %v18_v8  ;;  %v20_v16 = vld [vmem:[%s355_s1 + $0x28] sm:$0x1f]  ;;  %v21_v22 = vld [vmem:[%s355_s1 + $0x30] sm:$0x1f]  ;;  %v22_v28 = vld [vmem:[%s355_s1 + $0x38] sm:$0x1f] }
   0x5   :  { %v54_v17 = vperm.slane %v11_v0, 6  ;;  %v110_v18 = vmul.f32 %v52_v9, %v19_v12  ;;  %v12_v21 = vld [vmem:[%s354_s0 + $0x8] sm:$0xff]  ;;  %v55_v25 = vperm.slane %v11_v0, 7  ;;  %v111_v26 = vmul.f32 %v53_v14, %v20_v16  ;;  %v23_v33 = vld [vmem:[%s355_s1 + $0x40] sm:$0x1f]  ;;  %v13_v63 = vld [vmem:[%s354_s0 + $0x10] sm:$0xff] }
   0x6   :  { %v136_v19 = vsel %vm135_vm0, %v106_v10, 0.0  ;;  %v137_v20 = vsel %vm135_vm0, %v107_v11, 0.0  ;;  %v139_v24 = vsel %vm135_vm0, %v108_v13, 0.0  ;;  %v141_v27 = vsel %vm135_vm0, %v109_v15, 0.0  ;;  %v24_v38 = vld [vmem:[%s355_s1 + $0x48] sm:$0x1f] }
   0x7   :  { %v138_v23 = vadd.f32 %v137_v20, %v136_v19  ;;  %v56_v30 = vperm.slane %v12_v21, 0  ;;  %v112_v31 = vmul.f32 %v54_v17, %v21_v22  ;;  %v143_v32 = vsel %vm135_vm0, %v110_v18, 0.0  ;;  %v25_v43 = vld [vmem:[%s355_s1 + $0x50] sm:$0x1f]  ;;  %v26_v48 = vld [vmem:[%s355_s1 + $0x58] sm:$0x1f] }
   0x8   :  { %v57_v35 = vperm.slane %v12_v21, 1  ;;  %v113_v36 = vmul.f32 %v55_v25, %v22_v28  ;;  %v145_v37 = vsel %vm135_vm0, %v111_v26, 0.0  ;;  %v58_v40 = vperm.slane %v12_v21, 2  ;;  %v27_v53 = vld [vmem:[%s355_s1 + $0x60] sm:$0x1f] }
   0x9   :  { %v140_v29 = vadd.f32 %v139_v24, %v138_v23  ;;  %v114_v41 = vmul.f32 %v56_v30, %v23_v33  ;;  %v147_v42 = vsel %vm135_vm0, %v112_v31, 0.0  ;;  %v59_v45 = vperm.slane %v12_v21, 3  ;;  %v28_v58 = vld [vmem:[%s355_s1 + $0x68] sm:$0x1f]  ;;  %v29_v0 = vld [vmem:[%s355_s1 + $0x70] sm:$0x1f] }
   0xa   :  { %v115_v46 = vmul.f32 %v57_v35, %v24_v38  ;;  %v149_v47 = vsel %vm135_vm0, %v113_v36, 0.0  ;;  %v60_v50 = vperm.slane %v12_v21, 4  ;;  %v116_v51 = vmul.f32 %v58_v40, %v25_v43  ;;  %v30_v5 = vld [vmem:[%s355_s1 + $0x78] sm:$0x1f]  ;;  %v31_v10 = vld [vmem:[%s355_s1 + $0x80] sm:$0x1f] }
   0xb   :  { %v142_v34 = vadd.f32 %v141_v27, %v140_v29  ;;  %v151_v52 = vsel %vm135_vm0, %v114_v41, 0.0  ;;  %v61_v55 = vperm.slane %v12_v21, 5  ;;  %v117_v56 = vmul.f32 %v59_v45, %v26_v48  ;;  %v32_v15 = vld [vmem:[%s355_s1 + $0x88] sm:$0x1f]  ;;  %v33_v20 = vld [vmem:[%s355_s1 + $0x90] sm:$0x1f] }
   0xc   :  { %v153_v57 = vsel %vm135_vm0, %v115_v46, 0.0  ;;  %v62_v60 = vperm.slane %v12_v21, 6  ;;  %v118_v61 = vmul.f32 %v60_v50, %v27_v53  ;;  %v155_v62 = vsel %vm135_vm0, %v116_v51, 0.0  ;;  %v34_v25 = vld [vmem:[%s355_s1 + $0x98] sm:$0x1f] }
   0xd   :  { %v144_v39 = vadd.f32 %v143_v32, %v142_v34  ;;  %v63_v2 = vperm.slane %v12_v21, 7  ;;  %v119_v3 = vmul.f32 %v61_v55, %v28_v58  ;;  %v157_v4 = vsel %vm135_vm0, %v117_v56, 0.0  ;;  %v35_v30 = vld [vmem:[%s355_s1 + $0xa0] sm:$0x1f]  ;;  %v36_v35 = vld [vmem:[%s355_s1 + $0xa8] sm:$0x1f] }
   0xe   :  { %v64_v7 = vperm.slane %v13_v63, 0  ;;  %v120_v8 = vmul.f32 %v62_v60, %v29_v0  ;;  %v159_v9 = vsel %vm135_vm0, %v118_v61, 0.0  ;;  %v65_v12 = vperm.slane %v13_v63, 1  ;;  %v14_v40 = vld [vmem:[%s354_s0 + $0x18] sm:$0x1f] }
   0xf   :  { %v146_v44 = vadd.f32 %v145_v37, %v144_v39  ;;  %v121_v13 = vmul.f32 %v63_v2, %v30_v5  ;;  %v161_v14 = vsel %vm135_vm0, %v119_v3, 0.0  ;;  %v66_v17 = vperm.slane %v13_v63, 2  ;;  %v37_v41 = vld [vmem:[%s355_s1 + $0xb0] sm:$0x1f]  ;;  %v38_v46 = vld [vmem:[%s355_s1 + $0xb8] sm:$0x1f] }
  0x10   :  { %v122_v18 = vmul.f32 %v64_v7, %v31_v10  ;;  %v163_v19 = vsel %vm135_vm0, %v120_v8, 0.0  ;;  %v67_v22 = vperm.slane %v13_v63, 3  ;;  %v123_v23 = vmul.f32 %v65_v12, %v32_v15  ;;  %v39_v51 = vld [vmem:[%s355_s1 + $0xc0] sm:$0x1f]  ;;  %v40_v56 = vld [vmem:[%s355_s1 + $0xc8] sm:$0x1f] }
  0x11   :  { %v148_v49 = vadd.f32 %v147_v42, %v146_v44  ;;  %v165_v24 = vsel %vm135_vm0, %v121_v13, 0.0  ;;  %v68_v27 = vperm.slane %v13_v63, 4  ;;  %v124_v28 = vmul.f32 %v66_v17, %v33_v20  ;;  %v41_v61 = vld [vmem:[%s355_s1 + $0xd0] sm:$0x1f]  ;;  %v42_v2 = vld [vmem:[%s355_s1 + $0xd8] sm:$0x1f] }
  0x12   :  { %v167_v29 = vsel %vm135_vm0, %v122_v18, 0.0  ;;  %v69_v32 = vperm.slane %v13_v63, 5  ;;  %v125_v33 = vmul.f32 %v67_v22, %v34_v25  ;;  %v169_v34 = vsel %vm135_vm0, %v123_v23, 0.0  ;;  %v43_v7 = vld [vmem:[%s355_s1 + $0xe0] sm:$0x1f]  ;;  %s208_s1 = smov 7  }
  0x13   :  { %v150_v54 = vadd.f32 %v149_v47, %v148_v49  ;;  %v70_v37 = vperm.slane %v13_v63, 6  ;;  %v126_v38 = vmul.f32 %v68_v27, %v35_v30  ;;  %v171_v39 = vsel %vm135_vm0, %v124_v28, 0.0 }
  0x14   :  { %v71_v43 = vperm.slane %v13_v63, 7  ;;  %v127_v44 = vmul.f32 %v69_v32, %v36_v35  ;;  %v173_v45 = vsel %vm135_vm0, %v125_v33, 0.0  ;;  %v72_v48 = vperm.slane %v14_v40, 0 }
  0x15   :  { %v152_v59 = vadd.f32 %v151_v52, %v150_v54  ;;  %v128_v49 = vmul.f32 %v70_v37, %v37_v41  ;;  %v175_v50 = vsel %vm135_vm0, %v126_v38, 0.0  ;;  %v73_v53 = vperm.slane %v14_v40, 1 }
  0x16   :  { %v129_v54 = vmul.f32 %v71_v43, %v38_v46  ;;  %v177_v55 = vsel %vm135_vm0, %v127_v44, 0.0  ;;  %v74_v58 = vperm.slane %v14_v40, 2  ;;  %v75_v63 = vperm.slane %v14_v40, 3 }
  0x17   :  { %v154_v1 = vadd.f32 %v153_v57, %v152_v59  ;;  %v130_v59 = vmul.f32 %v72_v48, %v39_v51  ;;  %v179_v60 = vsel %vm135_vm0, %v128_v49, 0.0  ;;  %v131_v0 = vmul.f32 %v73_v53, %v40_v56 }
  0x18   :  { %v132_v5 = vmul.f32 %v74_v58, %v41_v61 }
  0x19   :  { %v156_v6 = vadd.f32 %v155_v62, %v154_v1  ;;  %v181_v1 = vsel %vm135_vm0, %v129_v54, 0.0  ;;  %v185_v10 = vsel %vm135_vm0, %v131_v0, 0.0 }
  0x1a   :  { %v187_v13 = vsel %vm135_vm0, %v132_v5, 0.0 }
  0x1b   :  { %v158_v11 = vadd.f32 %v157_v4, %v156_v6  ;;  %v76_v4 = vperm.slane %v14_v40, 4  ;;  %v183_v6 = vsel %vm135_vm0, %v130_v59, 0.0 }
  0x1d   :  { %v160_v16 = vadd.f32 %v159_v9, %v158_v11  ;;  %v133_v9 = vmul.f32 %v75_v63, %v42_v2  ;;  %v134_v12 = vmul.f32 %v76_v4, %v43_v7 }
  0x1f   :  { %v162_v21 = vadd.f32 %v161_v14, %v160_v16  ;;  %v189_v15 = vsel %vm135_vm0, %v133_v9, 0.0  ;;  %v192_v17 = vsel %vm191_vm1, %v134_v12, 0.0 }
  0x21   :  { %v164_v26 = vadd.f32 %v163_v19, %v162_v21 }
  0x23   :  { %v166_v31 = vadd.f32 %v165_v24, %v164_v26 }
  0x25   :  { %v168_v36 = vadd.f32 %v167_v29, %v166_v31 }
  0x27   :  { %v170_v42 = vadd.f32 %v169_v34, %v168_v36 }
  0x29   :  { %v172_v47 = vadd.f32 %v171_v39, %v170_v42 }
  0x2b   :  { %v174_v52 = vadd.f32 %v173_v45, %v172_v47 }
  0x2d   :  { %v176_v57 = vadd.f32 %v175_v50, %v174_v52 }
  0x2f   :  { %v178_v62 = vadd.f32 %v177_v55, %v176_v57 }
  0x31   :  { %v180_v3 = vadd.f32 %v179_v60, %v178_v62 }
  0x33   :  { %v182_v8 = vadd.f32 %v181_v1, %v180_v3 }
  0x35   :  { %v184_v11 = vadd.f32 %v183_v6, %v182_v8 }
  0x37   :  { %v186_v14 = vadd.f32 %v185_v10, %v184_v11 }
  0x39   :  { %v188_v16 = vadd.f32 %v187_v13, %v186_v14 }
  0x3b   :  { %v190_v18 = vadd.f32 %v189_v15, %v188_v16 }
  0x3d   :  { %v193_v19 = vadd.f32 %v192_v17, %v190_v18 }
  0x3f   :  { %194 = vadd.xlane.f32.xlu0 %v193_v19 }
  0xb2   :  { %v195_v20 = vpop.xlane.xlu0 %194 }
  0xb3   :  { %v196_v21 = vadd.f32 %v195_v20, %v43_v7 }
  0xb5   :  { %198 = vrot.lane.b32.xlu0 %v196_v21, %s208_s1 }
 0x127   :  { %v199_v22 = vpop.permute.xlu0 %198 }
 0x128   :  { %202 = vst.msk [vmem:[%s356_s2] sm:$0x1f] %vm201_vm2, %v199_v22 }

</bundles_post_ra>
